<compile_context>
chip_gen: v6e
topology: v6e:2x2x1
jax: 0.10.0
libtpu: 0.0.40
codegen_flags: <defaults>
</compile_context>

<pallas_src>
import functools

import jax
import jax.numpy as jnp
from jax.experimental import pallas as pl
from jax.experimental.pallas import tpu as pltpu


# ---------------------------------------------------------------------------
# Fast path: embedding table resident in VMEM, gather = dynamic row loads.
# ---------------------------------------------------------------------------
def _gather_rows_vmem_kernel(idx_ref, w_ref, out_ref, *, rows_per_step):
    """idx_ref: (Np,) int32 in SMEM (scalar-prefetched row indices)
    w_ref  : (Lp, Dp) whole embedding table, resident in VMEM (constant block index)
    out_ref: (rows_per_step, Dp) VMEM output tile for this grid step
    """
    g = pl.program_id(0)
    base = g * rows_per_step
    for j in range(rows_per_step):                 # static unroll, rows_per_step is small
        row = idx_ref[base + j]
        out_ref[j, :] = w_ref[row, :]              # dynamic-sublane VMEM load, 1-row store


# ---------------------------------------------------------------------------
# Fallback path: table stays in HBM; rows gathered by DMA, double-buffered
# across grid steps so step g's gather latency is hidden behind step g-1.
# ---------------------------------------------------------------------------
def _gather_rows_hbm_kernel(idx_ref, w_hbm, out_ref, buf, sems, *, rows_per_step):
    """idx_ref: (Np,) int32 SMEM; w_hbm: (L, Dp) table in HBM (memory_space=pl.ANY)
    out_ref: (rows_per_step, Dp) VMEM output tile
    buf    : (2, rows_per_step, Dp) VMEM DMA landing buffers (double buffer)
    sems   : (2, rows_per_step) DMA semaphores
    """
    g = pl.program_id(0)
    nsteps = pl.num_programs(0)

    def issue(step, slot):
        base = step * rows_per_step
        for j in range(rows_per_step):             # issue all row DMAs for this step/slot
            row = idx_ref[base + j]
            pltpu.make_async_copy(w_hbm.at[row], buf.at[slot, j], sems.at[slot, j]).start()

    @pl.when(g == 0)
    def _():                                       # prime slot 0 with this step's rows
        issue(0, 0)

    @pl.when(g + 1 < nsteps)
    def _():                                       # prefetch next step's rows into the other slot
        issue(g + 1, (g + 1) % 2)

    slot = g % 2
    for j in range(rows_per_step):                 # wait (src placeholder only fixes shape/size)
        pltpu.make_async_copy(w_hbm.at[0], buf.at[slot, j], sems.at[slot, j]).wait()

    out_ref[...] = buf[slot]                       # one lane-dense vector copy into the out tile


def prompt_encoder_forward(prompt_token_ids, input_ids, emb_weight, *,
                           id_offset=0, rows_per_step=8,
                           vmem_table_bytes_limit=4 * 1024 * 1024,
                           force_hbm_gather=False):
    """Pallas implementation of PromptEncoder.forward (+ canonical embedding forward_step).

    prompt_token_ids: (N,) int token ids appearing in the input
    input_ids:        (L,) int prompt token ids owned by this encoder
    emb_weight:       (L, D) f32 embedding table
    returns:          (N, D) f32 embeddings
    """
    tok = prompt_token_ids.reshape(-1).astype(jnp.int32)        # .view(-1, 1) flattens leading dims
    N = tok.shape[0]
    L, D = emb_weight.shape

    # ---- index computation: tiny O(N*L) integer work on the scalar/XLA path ----
    if id_offset > 0:
        idx = tok - id_offset
        # TODO(synk): PyTorch nn.Embedding raises for out-of-range ids; we clamp instead.
        idx = jnp.clip(idx, 0, L - 1).astype(jnp.int32)
    else:
        ids = input_ids.reshape(-1).astype(jnp.int32)
        match = (tok[:, None] == ids[None, :]).astype(jnp.int32)    # (N, L)
        # torch.argmax returns the FIRST maximal index; an all-zero row maps to 0.
        idx = jnp.argmax(match, axis=1).astype(jnp.int32)

    # ---- lane-dense width: pad D up to a multiple of 128 (no-op when D % 128 == 0) ----
    Dp = ((D + 127) // 128) * 128
    # ---- sublane-aligned output tiles: pad N up to a multiple of rows_per_step ----
    Np = ((N + rows_per_step - 1) // rows_per_step) * rows_per_step
    idx_p = idx if Np == N else jnp.pad(idx, (0, Np - N))           # padded rows gather row 0
    grid = (Np // rows_per_step,)

    itemsize = jnp.dtype(emb_weight.dtype).itemsize
    Lp = ((L + 7) // 8) * 8
    table_fits_vmem = (Lp * Dp * itemsize) <= vmem_table_bytes_limit and not force_hbm_gather

    if table_fits_vmem:
        # --- VMEM-resident table: constant-index block, fetched once, gathered with vector loads
        w = emb_weight
        if (Lp, Dp) != (L, D):
            w = jnp.pad(w, ((0, Lp - L), (0, Dp - D)))
        kernel = functools.partial(_gather_rows_vmem_kernel, rows_per_step=rows_per_step)
        out = pl.pallas_call(
            kernel,
            out_shape=jax.ShapeDtypeStruct((Np, Dp), emb_weight.dtype),
            grid_spec=pltpu.PrefetchScalarGridSpec(
                num_scalar_prefetch=1,                         # idx_p -> SMEM, first kernel arg
                grid=grid,
                in_specs=[pl.BlockSpec((Lp, Dp), lambda g, idx_ref: (0, 0))],
                out_specs=pl.BlockSpec((rows_per_step, Dp), lambda g, idx_ref: (g, 0)),
            ),
            compiler_params=pltpu.CompilerParams(
                dimension_semantics=("parallel",),             # independent row groups
            ),
        )(idx_p, w)
    else:
        # --- HBM row-gather DMA with cross-step double buffering
        w = emb_weight if Dp == D else jnp.pad(emb_weight, ((0, 0), (0, Dp - D)))
        kernel = functools.partial(_gather_rows_hbm_kernel, rows_per_step=rows_per_step)
        out = pl.pallas_call(
            kernel,
            out_shape=jax.ShapeDtypeStruct((Np, Dp), emb_weight.dtype),
            grid_spec=pltpu.PrefetchScalarGridSpec(
                num_scalar_prefetch=1,
                grid=grid,
                in_specs=[pl.BlockSpec(memory_space=pl.ANY)],  # W stays in HBM; rows DMA'd on demand
                out_specs=pl.BlockSpec((rows_per_step, Dp), lambda g, idx_ref: (g, 0)),
                scratch_shapes=[
                    pltpu.VMEM((2, rows_per_step, Dp), emb_weight.dtype),
                    pltpu.SemaphoreType.DMA((2, rows_per_step)),
                ],
            ),
            compiler_params=pltpu.CompilerParams(
                dimension_semantics=("arbitrary",),            # scratch carries state across steps
            ),
        )(idx_p, w)

    return out[:N, :D]


def _reference_forward(prompt_token_ids, input_ids, emb_weight, id_offset=0):
    """Pure-JAX reference mirroring the PyTorch semantics."""
    tok = prompt_token_ids.reshape(-1).astype(jnp.int32)
    L = emb_weight.shape[0]
    if id_offset > 0:
        idx = jnp.clip(tok - id_offset, 0, L - 1)
    else:
        match = (tok[:, None] == input_ids.reshape(-1)[None, :]).astype(jnp.int32)
        idx = jnp.argmax(match, axis=1)
    return emb_weight[idx, :]


if __name__ == "__main__":
    # Module-implied small shapes: length L = 8 prompt slots, embedding_dim D = 32,
    # a flattened batch of N = 16 incoming prompt token ids.
    length = 8          # self.length
    embedding_dim = 32  # self.embedding_dim
    n_tokens = 16

    key = jax.random.PRNGKey(0)
    k_emb, k_tok = jax.random.split(key)

    # self.input_ids = Parameter(torch.tensor(prompt_ids)) -- deterministic synthetic ids
    prompt_ids = jnp.arange(1000, 1000 + length, dtype=jnp.int32)          # (L,)
    # self.embedding = nn.Embedding(length, embedding_dim)
    emb_weight = jax.random.normal(k_emb, (length, embedding_dim), dtype=jnp.float32)

    # incoming prompt_token_ids: values drawn from the encoder's own prompt id vocabulary
    tok_choice = jax.random.randint(k_tok, (n_tokens,), 0, length)
    prompt_token_ids = prompt_ids[tok_choice]                              # (N,)

    for force_hbm in (False, True):   # exercise both the VMEM-resident and the HBM-DMA paths
        # Branch 1: id_offset == 0 -> token-matching (first-occurrence argmax) path.
        out = prompt_encoder_forward(prompt_token_ids, prompt_ids, emb_weight,
                                     id_offset=0, force_hbm_gather=force_hbm)
        out = jax.block_until_ready(out)
        ref = _reference_forward(prompt_token_ids, prompt_ids, emb_weight, 0)
        assert out.shape == (n_tokens, embedding_dim)
        assert jnp.allclose(out, ref, atol=1e-6, rtol=1e-6), \
            f"mismatch vs reference (match path, force_hbm={force_hbm})"

        # Branch 2: id_offset > 0 -> direct offset-subtraction path.
        id_offset = 1000
        out2 = prompt_encoder_forward(prompt_token_ids, prompt_ids, emb_weight,
                                      id_offset=id_offset, force_hbm_gather=force_hbm)
        out2 = jax.block_until_ready(out2)
        ref2 = _reference_forward(prompt_token_ids, prompt_ids, emb_weight, id_offset)
        assert jnp.allclose(out2, ref2, atol=1e-6, rtol=1e-6), \
            f"mismatch vs reference (offset path, force_hbm={force_hbm})"

    print("KERNEL_OK")
</pallas_src>

<mosaic_0001>
module attributes {stable_mosaic.version = 11 : i64} {
  func.func @_gather_rows_vmem_kernel(%arg0: i32, %arg1: memref<16xi32, #tpu.memory_space<smem>>, %arg2: memref<8x128xf32, #tpu.memory_space<vmem>>, %arg3: memref<8x128xf32, #tpu.memory_space<vmem>>) attributes {dimension_semantics = [#tpu.dimension_semantics<parallel>], iteration_bounds = array<i64: 2>, scalar_prefetch = 1 : i64, scratch_operands = 0 : i64, tpu.core_type = #tpu.core_type<tc>, window_params = [{pipeline_mode = #tpu.pipeline_mode<synchronous>, transform_indices = @transform_0, window_bounds = array<i64: 8, 128>}, {transform_indices = @transform_1, window_bounds = array<i64: 8, 128>}]} {
    %c8_i32 = arith.constant 8 : i32
    %0 = arith.muli %arg0, %c8_i32 : i32
    %c0_i32 = arith.constant 0 : i32
    %1 = arith.addi %0, %c0_i32 : i32
    %2 = arith.index_cast %1 : i32 to index
    %3 = memref.load %arg1[%2] : memref<16xi32, #tpu.memory_space<smem>>
    %4 = arith.index_cast %3 : i32 to index
    %c0 = arith.constant 0 : index
    %5 = vector.load %arg2[%4, %c0] : memref<8x128xf32, #tpu.memory_space<vmem>>, vector<1x128xf32>
    %6 = vector.shape_cast %5 : vector<1x128xf32> to vector<128xf32>
    %c0_0 = arith.constant 0 : index
    %c0_1 = arith.constant 0 : index
    %7 = vector.load %arg3[%c0_0, %c0_1] : memref<8x128xf32, #tpu.memory_space<vmem>>, vector<1x128xf32>
    %8 = vector.shape_cast %7 : vector<1x128xf32> to vector<128xf32>
    %9 = vector.shape_cast %6 : vector<128xf32> to vector<1x128xf32>
    tpu.vector_store %arg3[%c0_0, %c0_1], %9 {strides = array<i32>} : memref<8x128xf32, #tpu.memory_space<vmem>>, vector<1x128xf32>,
    %c1_i32 = arith.constant 1 : i32
    %10 = arith.addi %0, %c1_i32 : i32
    %11 = arith.index_cast %10 : i32 to index
    %12 = memref.load %arg1[%11] : memref<16xi32, #tpu.memory_space<smem>>
    %13 = arith.index_cast %12 : i32 to index
    %c0_2 = arith.constant 0 : index
    %14 = vector.load %arg2[%13, %c0_2] : memref<8x128xf32, #tpu.memory_space<vmem>>, vector<1x128xf32>
    %15 = vector.shape_cast %14 : vector<1x128xf32> to vector<128xf32>
    %c1 = arith.constant 1 : index
    %c0_3 = arith.constant 0 : index
    %16 = vector.load %arg3[%c1, %c0_3] : memref<8x128xf32, #tpu.memory_space<vmem>>, vector<1x128xf32>
    %17 = vector.shape_cast %16 : vector<1x128xf32> to vector<128xf32>
    %18 = vector.shape_cast %15 : vector<128xf32> to vector<1x128xf32>
    tpu.vector_store %arg3[%c1, %c0_3], %18 {strides = array<i32>} : memref<8x128xf32, #tpu.memory_space<vmem>>, vector<1x128xf32>,
    %c2_i32 = arith.constant 2 : i32
    %19 = arith.addi %0, %c2_i32 : i32
    %20 = arith.index_cast %19 : i32 to index
    %21 = memref.load %arg1[%20] : memref<16xi32, #tpu.memory_space<smem>>
    %22 = arith.index_cast %21 : i32 to index
    %c0_4 = arith.constant 0 : index
    %23 = vector.load %arg2[%22, %c0_4] : memref<8x128xf32, #tpu.memory_space<vmem>>, vector<1x128xf32>
    %24 = vector.shape_cast %23 : vector<1x128xf32> to vector<128xf32>
    %c2 = arith.constant 2 : index
    %c0_5 = arith.constant 0 : index
    %25 = vector.load %arg3[%c2, %c0_5] : memref<8x128xf32, #tpu.memory_space<vmem>>, vector<1x128xf32>
    %26 = vector.shape_cast %25 : vector<1x128xf32> to vector<128xf32>
    %27 = vector.shape_cast %24 : vector<128xf32> to vector<1x128xf32>
    tpu.vector_store %arg3[%c2, %c0_5], %27 {strides = array<i32>} : memref<8x128xf32, #tpu.memory_space<vmem>>, vector<1x128xf32>,
    %c3_i32 = arith.constant 3 : i32
    %28 = arith.addi %0, %c3_i32 : i32
    %29 = arith.index_cast %28 : i32 to index
    %30 = memref.load %arg1[%29] : memref<16xi32, #tpu.memory_space<smem>>
    %31 = arith.index_cast %30 : i32 to index
    %c0_6 = arith.constant 0 : index
    %32 = vector.load %arg2[%31, %c0_6] : memref<8x128xf32, #tpu.memory_space<vmem>>, vector<1x128xf32>
    %33 = vector.shape_cast %32 : vector<1x128xf32> to vector<128xf32>
    %c3 = arith.constant 3 : index
    %c0_7 = arith.constant 0 : index
    %34 = vector.load %arg3[%c3, %c0_7] : memref<8x128xf32, #tpu.memory_space<vmem>>, vector<1x128xf32>
    %35 = vector.shape_cast %34 : vector<1x128xf32> to vector<128xf32>
    %36 = vector.shape_cast %33 : vector<128xf32> to vector<1x128xf32>
    tpu.vector_store %arg3[%c3, %c0_7], %36 {strides = array<i32>} : memref<8x128xf32, #tpu.memory_space<vmem>>, vector<1x128xf32>,
    %c4_i32 = arith.constant 4 : i32
    %37 = arith.addi %0, %c4_i32 : i32
    %38 = arith.index_cast %37 : i32 to index
    %39 = memref.load %arg1[%38] : memref<16xi32, #tpu.memory_space<smem>>
    %40 = arith.index_cast %39 : i32 to index
    %c0_8 = arith.constant 0 : index
    %41 = vector.load %arg2[%40, %c0_8] : memref<8x128xf32, #tpu.memory_space<vmem>>, vector<1x128xf32>
    %42 = vector.shape_cast %41 : vector<1x128xf32> to vector<128xf32>
    %c4 = arith.constant 4 : index
    %c0_9 = arith.constant 0 : index
    %43 = vector.load %arg3[%c4, %c0_9] : memref<8x128xf32, #tpu.memory_space<vmem>>, vector<1x128xf32>
    %44 = vector.shape_cast %43 : vector<1x128xf32> to vector<128xf32>
    %45 = vector.shape_cast %42 : vector<128xf32> to vector<1x128xf32>
    tpu.vector_store %arg3[%c4, %c0_9], %45 {strides = array<i32>} : memref<8x128xf32, #tpu.memory_space<vmem>>, vector<1x128xf32>,
    %c5_i32 = arith.constant 5 : i32
    %46 = arith.addi %0, %c5_i32 : i32
    %47 = arith.index_cast %46 : i32 to index
    %48 = memref.load %arg1[%47] : memref<16xi32, #tpu.memory_space<smem>>
    %49 = arith.index_cast %48 : i32 to index
    %c0_10 = arith.constant 0 : index
    %50 = vector.load %arg2[%49, %c0_10] : memref<8x128xf32, #tpu.memory_space<vmem>>, vector<1x128xf32>
    %51 = vector.shape_cast %50 : vector<1x128xf32> to vector<128xf32>
    %c5 = arith.constant 5 : index
    %c0_11 = arith.constant 0 : index
    %52 = vector.load %arg3[%c5, %c0_11] : memref<8x128xf32, #tpu.memory_space<vmem>>, vector<1x128xf32>
    %53 = vector.shape_cast %52 : vector<1x128xf32> to vector<128xf32>
    %54 = vector.shape_cast %51 : vector<128xf32> to vector<1x128xf32>
    tpu.vector_store %arg3[%c5, %c0_11], %54 {strides = array<i32>} : memref<8x128xf32, #tpu.memory_space<vmem>>, vector<1x128xf32>,
    %c6_i32 = arith.constant 6 : i32
    %55 = arith.addi %0, %c6_i32 : i32
    %56 = arith.index_cast %55 : i32 to index
    %57 = memref.load %arg1[%56] : memref<16xi32, #tpu.memory_space<smem>>
    %58 = arith.index_cast %57 : i32 to index
    %c0_12 = arith.constant 0 : index
    %59 = vector.load %arg2[%58, %c0_12] : memref<8x128xf32, #tpu.memory_space<vmem>>, vector<1x128xf32>
    %60 = vector.shape_cast %59 : vector<1x128xf32> to vector<128xf32>
    %c6 = arith.constant 6 : index
    %c0_13 = arith.constant 0 : index
    %61 = vector.load %arg3[%c6, %c0_13] : memref<8x128xf32, #tpu.memory_space<vmem>>, vector<1x128xf32>
    %62 = vector.shape_cast %61 : vector<1x128xf32> to vector<128xf32>
    %63 = vector.shape_cast %60 : vector<128xf32> to vector<1x128xf32>
    tpu.vector_store %arg3[%c6, %c0_13], %63 {strides = array<i32>} : memref<8x128xf32, #tpu.memory_space<vmem>>, vector<1x128xf32>,
    %c7_i32 = arith.constant 7 : i32
    %64 = arith.addi %0, %c7_i32 : i32
    %65 = arith.index_cast %64 : i32 to index
    %66 = memref.load %arg1[%65] : memref<16xi32, #tpu.memory_space<smem>>
    %67 = arith.index_cast %66 : i32 to index
    %c0_14 = arith.constant 0 : index
    %68 = vector.load %arg2[%67, %c0_14] : memref<8x128xf32, #tpu.memory_space<vmem>>, vector<1x128xf32>
    %69 = vector.shape_cast %68 : vector<1x128xf32> to vector<128xf32>
    %c7 = arith.constant 7 : index
    %c0_15 = arith.constant 0 : index
    %70 = vector.load %arg3[%c7, %c0_15] : memref<8x128xf32, #tpu.memory_space<vmem>>, vector<1x128xf32>
    %71 = vector.shape_cast %70 : vector<1x128xf32> to vector<128xf32>
    %72 = vector.shape_cast %69 : vector<128xf32> to vector<1x128xf32>
    tpu.vector_store %arg3[%c7, %c0_15], %72 {strides = array<i32>} : memref<8x128xf32, #tpu.memory_space<vmem>>, vector<1x128xf32>,
    return
  }
  func.func @transform_0(%arg0: i32, %arg1: memref<16xi32, #tpu.memory_space<smem>>) -> (i32, i32) {
    %c0_i32 = arith.constant 0 : i32
    %c0_i32_0 = arith.constant 0 : i32
    %c0_i32_1 = arith.constant 0 : i32
    return %c0_i32, %c0_i32_0 : i32, i32
  }
  func.func @transform_1(%arg0: i32, %arg1: memref<16xi32, #tpu.memory_space<smem>>) -> (i32, i32) {
    %c0_i32 = arith.constant 0 : i32
    %c0_i32_0 = arith.constant 0 : i32
    return %arg0, %c0_i32 : i32, i32
  }
}

</mosaic_0001>

<bundles_post_ra>
// kernel: tpu_custom_call.1
= control target key start
LH: loop header
LB: loop body
LE: loop exit
PB: predicated region body
PF: predicated region fallthrough
CT: control target
= control target key end

     0   :  { %s398_s9 = smov [#allocation3]   ;;  %s536_s0 = inlined_call_operand.hbm [shape: s32[16], index: 0, kind: input, shape index: {}]   ;;  %s537_s1 = inlined_call_operand.hbm [shape: f32[8,128], index: 1, kind: input, shape index: {}]   ;;  %s538_s2 = inlined_call_operand.hbm [shape: f32[16,128], index: 2, kind: output, shape index: {}]  }
   0x1   :  { %540 = sst [smem:[#allocation11_spill]] %s537_s1 }
   0x2   :  { %8 = dma.hbm_to_smem %s536_s0, 16, %s398_s9, [#allocation2] }
   0x3   :  { %372 = dma.done.wait [#allocation2], 16 }
   0x4   :  { %373 = vsyncadd [#allocation2], 4294967280 }
   0x5   :  { %10 = sfence }
   0x6   :  { %11 = vsyncpa [#allocation5], 0 }
   0x7   :  { %12 = vsyncpa [#allocation6], 0 }
   0x8   :  { %14 = vsyncpa [#allocation6 + $0x1], 0  ;;  %s419_s12 = smov 0   ;;  %s421_s13 = smov 0  }
   0x9   :  { %s423_s14 = smov 0   ;;  %s425_s15 = smov 0  }
   0xa LB: > { %s440_s0 = sadd.s32 4294967295, %s396_s15   ;;  %s234_s16 = sadd.s32 4294967294, %s396_s15   ;;  %s396_s15 = sphi %s425_s15, %s550_s15   ;;  %s392_s14 = sphi %s423_s14, %s549_s14   ;;  %s388_s13 = sphi %s421_s13, %s548_s13   ;;  %s384_s12 = sphi %s419_s12, %s547_s12  }
   0xb   : > { %s444_s17 = sadd.s32 1, %s396_s15   ;;  %s48_s18 = sadd.s32 1, %s392_s14 }
   0xc   : > { %s45_s19 = ssub.s32 %s396_s15, %s444_s17  ;;  %p58_p0 = scmp.ne.s32.totalorder %s392_s14, %s388_s13 }
   0xd   : > { %p46_p1 = scmp.eq.s32.totalorder %s45_s19, 0  ;;  %p59_p2 = scmp.eq.s32.totalorder %s440_s0, 1 }
   0xe   : > { %p64_p3 = scmp.ne.s32.totalorder %s388_s13, %s384_s12  ;;  %p65_p4 = scmp.eq.s32.totalorder %s234_s16, 1 }
   0xf   : > { %s455_s20 = scalar_select %p46_p1, %s392_s14, %s48_s18  }
  0x10   : > { %p457_p5 = por %p59_p2, %p58_p0  ;;  %p461_p6 = por %p65_p4, %p64_p3 }
  0x11   : > { %p235_p7 = scmp.ge.s32.totalorder %s396_s15, 1  ;;  %p72_p8 = scmp.lt.s32.totalorder %s396_s15, 3 }
  0x12   : > { %s542_s22 = scalar_select %p461_p6, 1, 0 }
  0x13   : > { %p259_p9 = scmp.eq.s32.totalorder %s440_s0, 0  ;;  %p468_p10 = pnand %p235_p7, %p72_p8 }
  0x14   : > { %s399_s24 = smov [#allocation4]  }
  0x15   : > { %s85_s25 = sshll.u32 %s399_s24, 4  ;;  %p251_p11 = pneg %p468_p10  ;;  %s86_s25 = int_to_ptr.vmem [resolvable:$true] %s85_s25 }
  0x16   : > { %s315_s26 = scalar_lea.vmem %s86_s25, 128  ;;  %p323_p3 = scmp.lt.s32.totalorder %s86_s25, %s86_s25 }
  0x17   : > { %p252_p12 = pnand %p259_p9, %p251_p11  ;;  %p316_p0 = scmp.ne.s32.totalorder %s86_s25, %s315_s26 }
  0x18   : > { %p324_p4 = scmp.lt.s32.totalorder %s315_s26, %s315_s26 }
  0x19   : > { %p306_p13 = pneg %p252_p12 }
  0x1a   : > { %p325_p6 = por %p324_p4, %p323_p3 }
  0x1b   : > { %p318_p1 = pnand %p316_p0, %p306_p13 }
  0x1d   : > { %p319_p2 = pneg %p318_p1 }
  0x1f   : > { %p326_p7 = pnand %p325_p6, %p319_p2 }
  0x21   : > { %329 = shalt.err (!%p326_p7)
}
  0x22   : > { %s544_s1 = sld [smem:[#allocation11_spill]] }
  0x24   : > { %98 = sbr.rel (%p468_p10) target bundleno = 80 (0x50), region = 24 }
  0x28   : > { %254 = dma.hbm_to_vmem [thread:$0]  (!%p252_p12), %s544_s1, 128, %s86_s25, [#allocation5]  }
  0x29   : > { %375 = dma.done.wait (%p259_p9), [#allocation5], 128  }
  0x2a   : > { %377 = vsyncadd (%p259_p9), [#allocation5], 4294967168  ;;  %s539_s29 = sand.u32 1, %s388_s13   ;;  %s240_s30 = sshll.u32 %s440_s0, 3 }
  0x2b   : > { %s239_s3 = sshll.u32 %s539_s29, 3  ;;  %s114_s4 = sld [smem:[#allocation3 + %s240_s30]] }
  0x2c   : > { %s118_s5 = sadd.s32 1, %s240_s30  ;;  %s123_s6 = sadd.s32 2, %s240_s30 }
  0x2d   : > { %s119_s7 = sld [smem:[#allocation3 + %s118_s5]]  ;;  %s128_s8 = sadd.s32 3, %s240_s30 }
  0x2e   : > { %s124_s9 = sld [smem:[#allocation3 + %s123_s6]]  ;;  %s133_s10 = sadd.s32 4, %s240_s30 }
  0x2f   : > { %s129_s11 = sld [smem:[#allocation3 + %s128_s8]]  ;;  %s138_s16 = sadd.s32 5, %s240_s30 }
  0x30   : > { %s134_s18 = sld [smem:[#allocation3 + %s133_s10]]  ;;  %s143_s24 = sadd.s32 6, %s240_s30 }
  0x31   : > { %s115_s19 = scalar_lea.vmem [#allocation4], %s114_s4  ;;  %s139_s23 = sld [smem:[#allocation3 + %s138_s16]] }
  0x32   : > { %v116_v0 = vld [vmem:[%s115_s19] sm:$0x1]  ;;  %s112_s25 = scalar_lea.vmem [#allocation7], %s239_s3  ;;  %s144_s26 = sld [smem:[#allocation3 + %s143_s24]] }
  0x33   : > { %117 = vst [vmem:[%s112_s25] sm:$0x1] %v116_v0  ;;  %s148_s27 = sadd.s32 7, %s240_s30  ;;  %s120_s29 = scalar_lea.vmem [#allocation4], %s119_s7 }
  0x34   : > { %s149_s28 = sld [smem:[#allocation3 + %s148_s27]]  ;;  %v121_v1 = vld [vmem:[%s120_s29] sm:$0x1]  ;;  %s125_s5 = scalar_lea.vmem [#allocation4], %s124_s9 }
  0x35   : > { %122 = vst [vmem:[%s112_s25 + $0x1] sm:$0x1] %v121_v1  ;;  %v126_v2 = vld [vmem:[%s125_s5] sm:$0x1]  ;;  %s242_s6 = sshll.u32 %s440_s0, 7  ;;  %s130_s8 = scalar_lea.vmem [#allocation4], %s129_s11 }
  0x36   : > { %127 = vst [vmem:[%s112_s25 + $0x2] sm:$0x1] %v126_v2  ;;  %v131_v3 = vld [vmem:[%s130_s8] sm:$0x1]  ;;  %s167_s1 = sshll.u32 %s112_s25, 4  ;;  %s135_s4 = scalar_lea.vmem [#allocation4], %s134_s18  ;;  %s495_s1 = int_to_ptr.vmem [resolvable:$true] %s167_s1 }
  0x37   : > { %132 = vst [vmem:[%s112_s25 + $0x3] sm:$0x1] %v131_v3  ;;  %v136_v4 = vld [vmem:[%s135_s4] sm:$0x1]  ;;  %s140_s3 = scalar_lea.vmem [#allocation4], %s139_s23  ;;  %s493_s29 = scalar_lea.hbm %s538_s2, %s242_s6 }
  0x38   : > { %137 = vst [vmem:[%s112_s25 + $0x4] sm:$0x1] %v136_v4  ;;  %v141_v5 = vld [vmem:[%s140_s3] sm:$0x1]  ;;  %s145_s7 = scalar_lea.vmem [#allocation4], %s144_s26  ;;  %s545_s9 = sand.u32 1, %s388_s13  }
  0x39   : > { %142 = vst [vmem:[%s112_s25 + $0x5] sm:$0x1] %v141_v5  ;;  %v146_v6 = vld [vmem:[%s145_s7] sm:$0x1]  ;;  %s154_s11 = scalar_lea.sflag [#allocation6], %s545_s9  ;;  %s330_s16 = scalar_lea.vmem %s495_s1, 128 }
  0x3a   : > { %147 = vst [vmem:[%s112_s25 + $0x6] sm:$0x1] %v146_v6  ;;  %s150_s0 = scalar_lea.vmem [#allocation4], %s149_s28  ;;  %p331_p6 = scmp.ne.s32.totalorder %s495_s1, %s330_s16 }
  0x3b   : > { %v151_v7 = vld [vmem:[%s150_s0] sm:$0x1]  ;;  %s400_s18 = smov [#allocation7]  }
  0x3c   : > { %152 = vst [vmem:[%s112_s25 + $0x7] sm:$0x1] %v151_v7  ;;  %p332_p8 = pnand %p331_p6, %p457_p5  ;;  %s334_s19 = sshll.u32 %s400_s18, 4  ;;  %s335_s19 = int_to_ptr.vmem [resolvable:$false] %s334_s19 }
  0x3d   : > { %s336_s23 = scalar_lea.vmem %s335_s19, 256  ;;  %p337_p10 = scmp.lt.s32.totalorder %s495_s1, %s335_s19 }
  0x3e   : > { %p333_p9 = pneg %p332_p8  ;;  %p338_p11 = scmp.lt.s32.totalorder %s336_s23, %s330_s16 }
  0x40   : > { %p339_p12 = por %p338_p11, %p337_p10 }
  0x42   : > { %p340_p13 = pnand %p339_p12, %p333_p9 }
  0x44   : > { %343 = shalt.err (!%p340_p13)
}
  0x45   : > { %s344_s24 = scalar_lea.hbm %s493_s29, 128  ;;  %s348_s27 = scalar_lea.hbm %s538_s2, 256 }
  0x46   : > { %p345_p0 = scmp.ne.s32.totalorder %s493_s29, %s344_s24  ;;  %p349_p3 = scmp.lt.s32.totalorder %s493_s29, %s538_s2 }
  0x47   : > { %p350_p4 = scmp.lt.s32.totalorder %s348_s27, %s344_s24 }
  0x48   : > { %p346_p1 = pnand %p345_p0, %p457_p5 }
  0x49   : > { %p351_p7 = por %p350_p4, %p349_p3 }
  0x4a   : > { %p347_p2 = pneg %p346_p1 }
  0x4c   : > { %p352_p6 = pnand %p351_p7, %p347_p2 }
  0x4e   : > { %355 = shalt.err (!%p352_p6)
}
  0x4f   : > { %249 = dma.vmem_to_hbm [thread:$0]  (%p457_p5), %s495_s1, 128, %s493_s29, %s154_s11  }
  0x50 PF: > { %p261_p8 = scmp.ge.s32.totalorder %s396_s15, 2  ;;  %s179_s6 = sand.u32 1, %s384_s12  }
  0x51   : > { %p546_p9 = scmp.ne.s32.totalorder %s542_s22, 0  ;;  %s180_s8 = scalar_lea.sflag [#allocation6], %s179_s6 }
  0x53   : > { %p256_p10 = pnand %p261_p8, %p546_p9 }
  0x55   : > { %p257_p11 = pneg %p256_p10 }
  0x57   : > { %379 = dma.done.wait (%p257_p11), %s180_s8, 128  }
  0x58   : > { %381 = vsyncadd (%p257_p11), %s180_s8, 4294967168  ;;  %p17_p12 = scmp.ge.s32.totalorder %s444_s17, 4   ;;  %s547_s12 = smov %s388_s13 }
  0x59   : > { %s548_s13 = smov %s392_s14  ;;  %s549_s14 = smov %s455_s20 }
  0x5a   : > { %s550_s15 = smov %s444_s17  ;;  %19 = sbr.rel (!%p17_p12) target bundleno = 10 (0xa), region = 69 }
  0x5f   :  { %185 = vsyncpa [#allocation5], 1 }
  0x60   :  { %187 = vsyncpa [#allocation5 + $0x1], 1 }
  0x61   :  { %188 = vsyncpa [#allocation6], 1 }
  0x62   :  { %190 = vsyncpa [#allocation6 + $0x1], 1 }

</bundles_post_ra>
